<compile_context>
chip_gen: v7x
topology: tpu7x:2x2x1
jax: 0.10.0
libtpu: 0.0.40
codegen_flags: <defaults>
</compile_context>

<pallas_src>
import jax
import jax.numpy as jnp
from jax.experimental import pallas as pl
from jax.experimental.pallas import tpu as pltpu

NEG_SLOPE = 0.2        # args.neg_slope
IN_FEATURES = 784
H1 = 512
H2 = 256
TB_MAX = 1024          # max batch-tile rows (fits comfortably in scoped VMEM)


def _round_up(x, m):
    return (x + m - 1) // m * m


def _choose_tile(B):
    """Pick the batch tile size.

    - tiny batches: single tile, rounded to the f32 sublane granule (8).
    - otherwise: split into (at least) two tiles so both TensorCores get work
      on v7x, rounded to 16 rows; capped at TB_MAX.
    """
    if B > 2 * TB_MAX:
        return TB_MAX
    if B <= 16:
        return _round_up(B, 8)
    tb = _round_up(pl.cdiv(B, 2), 16)
    return min(tb, TB_MAX)


def discriminator_kernel(x_ref, w1_ref, b1_ref, w2_ref, b2_ref, w3_ref, b3_ref,
                         o_ref):
    # x tile: (tb, 784) f32 straight from HBM; cast to bf16 in-register for
    # the MXU (halves MXU passes vs f32), accumulate in f32.
    x = x_ref[...].astype(jnp.bfloat16)

    # Layer 1: Linear(784 -> 512) + bias + LeakyReLU (f32 on the VPU).
    h1 = jnp.dot(x, w1_ref[...], preferred_element_type=jnp.float32)
    h1 = h1 + b1_ref[...]                                  # (tb, 512)
    h1 = jnp.maximum(h1, NEG_SLOPE * h1)

    # Layer 2: Linear(512 -> 256) + bias + LeakyReLU.
    h2 = jnp.dot(h1.astype(jnp.bfloat16), w2_ref[...],
                 preferred_element_type=jnp.float32)
    h2 = h2 + b2_ref[...]                                  # (tb, 256)
    h2 = jnp.maximum(h2, NEG_SLOPE * h2)

    # Layer 3: Linear(256 -> 1).  N=1 wastes MXU columns, so do it as a
    # broadcast-multiply + lane reduction (VPU/XLU), fully in f32.
    h3 = jnp.sum(h2 * w3_ref[...], axis=-1, keepdims=True) + b3_ref[...]

    # Exact sigmoid: exp on the EUP, exact divide (tiny (tb, 1) tensor).
    o_ref[...] = 1.0 / (1.0 + jnp.exp(-h3))


@jax.jit
def discriminator_forward(img, params):
    """img: (B, 784) float32. Returns (B, 1) float32 in (0, 1)."""
    w1, b1, w2, b2, w3, b3 = params
    B = img.shape[0]

    tb = _choose_tile(B)
    grid_n = pl.cdiv(B, tb)        # partial last tile handled by Pallas

    # One-time casts of the (small, resident) matmul weights to bf16.
    w1b = w1.astype(jnp.bfloat16)
    w2b = w2.astype(jnp.bfloat16)
    w3r = w3.reshape(1, H2)        # row layout for the lane reduction

    resident = lambda i: (0, 0)    # weights/biases stay VMEM-resident

    out = pl.pallas_call(
        discriminator_kernel,
        out_shape=jax.ShapeDtypeStruct((B, 1), jnp.float32),
        grid=(grid_n,),
        in_specs=[
            pl.BlockSpec((tb, IN_FEATURES), lambda i: (i, 0)),  # x tile (f32)
            pl.BlockSpec((IN_FEATURES, H1), resident),          # w1 (bf16)
            pl.BlockSpec((1, H1), resident),                    # b1 (f32)
            pl.BlockSpec((H1, H2), resident),                   # w2 (bf16)
            pl.BlockSpec((1, H2), resident),                    # b2 (f32)
            pl.BlockSpec((1, H2), resident),                    # w3 row (f32)
            pl.BlockSpec((1, 1), resident),                     # b3 (f32)
        ],
        out_specs=pl.BlockSpec((tb, 1), lambda i: (i, 0)),
        compiler_params=pltpu.CompilerParams(
            dimension_semantics=("parallel",),
            vmem_limit_bytes=32 * 1024 * 1024,
        ),
    )(img, w1b, b1, w2b, b2, w3r, b3)

    return out


def init_params(key):
    """Deterministic PyTorch-style (Kaiming-uniform-ish) init.
    Weights stored as (in, out); biases as (1, out) rows for lane broadcast."""
    ks = jax.random.split(key, 6)

    def linear(kw, kb, fan_in, fan_out):
        bound = 1.0 / jnp.sqrt(fan_in)
        w = jax.random.uniform(kw, (fan_in, fan_out), jnp.float32,
                               minval=-bound, maxval=bound)
        b = jax.random.uniform(kb, (1, fan_out), jnp.float32,
                               minval=-bound, maxval=bound)
        return w, b

    w1, b1 = linear(ks[0], ks[1], IN_FEATURES, H1)
    w2, b2 = linear(ks[2], ks[3], H1, H2)
    w3, b3 = linear(ks[4], ks[5], H2, 1)
    return (w1, b1, w2, b2, w3, b3)


def reference_forward(img, params):
    """Pure-JAX f32 reference of the PyTorch module."""
    w1, b1, w2, b2, w3, b3 = params
    h1 = img @ w1 + b1
    h1 = jnp.where(h1 >= 0, h1, NEG_SLOPE * h1)
    h2 = h1 @ w2 + b2
    h2 = jnp.where(h2 >= 0, h2, NEG_SLOPE * h2)
    h3 = h2 @ w3 + b3
    return jax.nn.sigmoid(h3)


if __name__ == "__main__":
    key = jax.random.PRNGKey(0)
    k_img, k_params = jax.random.split(key)

    B = 8
    img = jax.random.normal(k_img, (B, IN_FEATURES), dtype=jnp.float32)
    params = init_params(k_params)

    out = discriminator_forward(img, params)
    out = jax.block_until_ready(out)

    ref = reference_forward(img, params)
    assert out.shape == (B, 1), out.shape
    # bf16 MXU matmuls (f32 accumulation) vs f32 reference; sigmoid is exact.
    assert jnp.allclose(out, ref, atol=1e-2, rtol=0.0), (
        "mismatch vs reference: max abs diff "
        f"{jnp.max(jnp.abs(out - ref))}")

    print("KERNEL_OK")
</pallas_src>

<mosaic_0001>
module attributes {stable_mosaic.version = 11 : i64} {
  func.func @discriminator_kernel(%arg0: i32, %arg1: memref<8x784xf32, #tpu.memory_space<vmem>>, %arg2: memref<784x512xbf16, #tpu.memory_space<vmem>>, %arg3: memref<1x512xf32, #tpu.memory_space<vmem>>, %arg4: memref<512x256xbf16, #tpu.memory_space<vmem>>, %arg5: memref<1x256xf32, #tpu.memory_space<vmem>>, %arg6: memref<1x256xf32, #tpu.memory_space<vmem>>, %arg7: memref<1x1xf32, #tpu.memory_space<vmem>>, %arg8: memref<8x1xf32, #tpu.memory_space<vmem>>) attributes {dimension_semantics = [#tpu.dimension_semantics<parallel>], iteration_bounds = array<i64: 1>, scalar_prefetch = 0 : i64, scratch_operands = 0 : i64, tpu.core_type = #tpu.core_type<tc>, window_params = [{transform_indices = @transform_0, window_bounds = array<i64: 8, 784>}, {pipeline_mode = #tpu.pipeline_mode<synchronous>, transform_indices = @transform_1, window_bounds = array<i64: 784, 512>}, {pipeline_mode = #tpu.pipeline_mode<synchronous>, transform_indices = @transform_2, window_bounds = array<i64: 1, 512>}, {pipeline_mode = #tpu.pipeline_mode<synchronous>, transform_indices = @transform_3, window_bounds = array<i64: 512, 256>}, {pipeline_mode = #tpu.pipeline_mode<synchronous>, transform_indices = @transform_4, window_bounds = array<i64: 1, 256>}, {pipeline_mode = #tpu.pipeline_mode<synchronous>, transform_indices = @transform_5, window_bounds = array<i64: 1, 256>}, {pipeline_mode = #tpu.pipeline_mode<synchronous>, transform_indices = @transform_6, window_bounds = array<i64: 1, 1>}, {transform_indices = @transform_7, window_bounds = array<i64: 8, 1>}]} {
    %c0 = arith.constant 0 : index
    %c0_0 = arith.constant 0 : index
    %0 = vector.load %arg1[%c0, %c0_0] : memref<8x784xf32, #tpu.memory_space<vmem>>, vector<8x784xf32>
    %1 = arith.truncf %0 : vector<8x784xf32> to vector<8x784xbf16>
    %c0_1 = arith.constant 0 : index
    %c0_2 = arith.constant 0 : index
    %2 = vector.load %arg2[%c0_1, %c0_2] : memref<784x512xbf16, #tpu.memory_space<vmem>>, vector<784x512xbf16>
    %cst = arith.constant dense<0.000000e+00> : vector<8x512xf32>
    %3 = tpu.matmul %1, %2, %cst {dimension_numbers = #tpu.dot_dimension_numbers<[1], [0], [0], [1], [0, 0, 1, 1], [], []>} : vector<8x784xbf16>, vector<784x512xbf16>, vector<8x512xf32> -> vector<8x512xf32>
    %c0_3 = arith.constant 0 : index
    %c0_4 = arith.constant 0 : index
    %4 = vector.load %arg3[%c0_3, %c0_4] : memref<1x512xf32, #tpu.memory_space<vmem>>, vector<1x512xf32>
    %5 = vector.broadcast %4 : vector<1x512xf32> to vector<8x512xf32>
    %6 = arith.addf %3, %5 : vector<8x512xf32>
    %cst_5 = arith.constant 2.000000e-01 : f32
    %7 = vector.broadcast %cst_5 : f32 to vector<8x512xf32>
    %8 = arith.mulf %7, %6 : vector<8x512xf32>
    %9 = arith.maximumf %6, %8 : vector<8x512xf32>
    %10 = arith.truncf %9 : vector<8x512xf32> to vector<8x512xbf16>
    %c0_6 = arith.constant 0 : index
    %c0_7 = arith.constant 0 : index
    %11 = vector.load %arg4[%c0_6, %c0_7] : memref<512x256xbf16, #tpu.memory_space<vmem>>, vector<512x256xbf16>
    %cst_8 = arith.constant dense<0.000000e+00> : vector<8x256xf32>
    %12 = tpu.matmul %10, %11, %cst_8 {dimension_numbers = #tpu.dot_dimension_numbers<[1], [0], [0], [1], [0, 0, 1, 1], [], []>} : vector<8x512xbf16>, vector<512x256xbf16>, vector<8x256xf32> -> vector<8x256xf32>
    %c0_9 = arith.constant 0 : index
    %c0_10 = arith.constant 0 : index
    %13 = vector.load %arg5[%c0_9, %c0_10] : memref<1x256xf32, #tpu.memory_space<vmem>>, vector<1x256xf32>
    %14 = vector.broadcast %13 : vector<1x256xf32> to vector<8x256xf32>
    %15 = arith.addf %12, %14 : vector<8x256xf32>
    %cst_11 = arith.constant 2.000000e-01 : f32
    %16 = vector.broadcast %cst_11 : f32 to vector<8x256xf32>
    %17 = arith.mulf %16, %15 : vector<8x256xf32>
    %18 = arith.maximumf %15, %17 : vector<8x256xf32>
    %c0_12 = arith.constant 0 : index
    %c0_13 = arith.constant 0 : index
    %19 = vector.load %arg6[%c0_12, %c0_13] : memref<1x256xf32, #tpu.memory_space<vmem>>, vector<1x256xf32>
    %20 = vector.broadcast %19 : vector<1x256xf32> to vector<8x256xf32>
    %21 = arith.mulf %18, %20 : vector<8x256xf32>
    %cst_14 = arith.constant dense<0.000000e+00> : vector<8xf32>
    %22 = vector.multi_reduction <add>, %21, %cst_14 [1] : vector<8x256xf32> to vector<8xf32>
    %23 = vector.shape_cast %22 : vector<8xf32> to vector<8x1xf32>
    %c0_15 = arith.constant 0 : index
    %c0_16 = arith.constant 0 : index
    %24 = vector.load %arg7[%c0_15, %c0_16] : memref<1x1xf32, #tpu.memory_space<vmem>>, vector<1x1xf32>
    %25 = vector.broadcast %24 : vector<1x1xf32> to vector<8x1xf32>
    %26 = arith.addf %23, %25 : vector<8x1xf32>
    %cst_17 = arith.constant 0.000000e+00 : f32
    %27 = vector.broadcast %cst_17 : f32 to vector<8x1xf32>
    %28 = arith.subf %27, %26 : vector<8x1xf32>
    %29 = math.exp %28 : vector<8x1xf32>
    %cst_18 = arith.constant 1.000000e+00 : f32
    %30 = vector.broadcast %cst_18 : f32 to vector<8x1xf32>
    %31 = arith.addf %30, %29 : vector<8x1xf32>
    %cst_19 = arith.constant 1.000000e+00 : f32
    %32 = vector.broadcast %cst_19 : f32 to vector<8x1xf32>
    %33 = arith.divf %32, %31 : vector<8x1xf32>
    %c0_20 = arith.constant 0 : index
    %c0_21 = arith.constant 0 : index
    %34 = vector.load %arg8[%c0_20, %c0_21] : memref<8x1xf32, #tpu.memory_space<vmem>>, vector<8x1xf32>
    tpu.vector_store %arg8[%c0_20, %c0_21], %33 {strides = array<i32>} : memref<8x1xf32, #tpu.memory_space<vmem>>, vector<8x1xf32>,
    return
  }
  func.func @transform_0(%arg0: i32) -> (i32, i32) {
    %c0_i32 = arith.constant 0 : i32
    %c0_i32_0 = arith.constant 0 : i32
    return %arg0, %c0_i32 : i32, i32
  }
  func.func @transform_1(%arg0: i32) -> (i32, i32) {
    %c0_i32 = arith.constant 0 : i32
    %c0_i32_0 = arith.constant 0 : i32
    %c0_i32_1 = arith.constant 0 : i32
    return %c0_i32, %c0_i32_0 : i32, i32
  }
  func.func @transform_2(%arg0: i32) -> (i32, i32) {
    %c0_i32 = arith.constant 0 : i32
    %c0_i32_0 = arith.constant 0 : i32
    %c0_i32_1 = arith.constant 0 : i32
    return %c0_i32, %c0_i32_0 : i32, i32
  }
  func.func @transform_3(%arg0: i32) -> (i32, i32) {
    %c0_i32 = arith.constant 0 : i32
    %c0_i32_0 = arith.constant 0 : i32
    %c0_i32_1 = arith.constant 0 : i32
    return %c0_i32, %c0_i32_0 : i32, i32
  }
  func.func @transform_4(%arg0: i32) -> (i32, i32) {
    %c0_i32 = arith.constant 0 : i32
    %c0_i32_0 = arith.constant 0 : i32
    %c0_i32_1 = arith.constant 0 : i32
    return %c0_i32, %c0_i32_0 : i32, i32
  }
  func.func @transform_5(%arg0: i32) -> (i32, i32) {
    %c0_i32 = arith.constant 0 : i32
    %c0_i32_0 = arith.constant 0 : i32
    %c0_i32_1 = arith.constant 0 : i32
    return %c0_i32, %c0_i32_0 : i32, i32
  }
  func.func @transform_6(%arg0: i32) -> (i32, i32) {
    %c0_i32 = arith.constant 0 : i32
    %c0_i32_0 = arith.constant 0 : i32
    %c0_i32_1 = arith.constant 0 : i32
    return %c0_i32, %c0_i32_0 : i32, i32
  }
  func.func @transform_7(%arg0: i32) -> (i32, i32) {
    %c0_i32 = arith.constant 0 : i32
    %c0_i32_0 = arith.constant 0 : i32
    return %arg0, %c0_i32 : i32, i32
  }
}

</mosaic_0001>

<bundles_post_ra>
// kernel: discriminator_forward.1
= control target key start
LH: loop header
LB: loop body
LE: loop exit
PB: predicated region body
PF: predicated region fallthrough
CT: control target
= control target key end

     0   :  { %vm1241_vm0 = vcmask 130048   ;;  %vm2098_vm1 = vcmask 7168   ;;  %s3705_s1 = inlined_call_operand.vmem [shape: bf16[784,512], index: 1, kind: input, shape index: {}]   ;;  %s3706_s0 = inlined_call_operand.vmem [shape: f32[8,784], index: 0, kind: input, shape index: {}]   ;;  %s3707_s3 = inlined_call_operand.vmem [shape: bf16[512,256], index: 3, kind: input, shape index: {}]   ;;  %s3708_s2 = inlined_call_operand.vmem [shape: f32[1,512], index: 2, kind: input, shape index: {}]   ;;  %s3709_s6 = inlined_call_operand.<no memory space> [shape: f32[1,1], index: 6, kind: input, shape index: {}]   ;;  %s3710_s4 = inlined_call_operand.vmem [shape: f32[1,256], index: 4, kind: input, shape index: {}]   ;;  %s3711_s5 = inlined_call_operand.vmem [shape: f32[1,256], index: 5, kind: input, shape index: {}]   ;;  %s3712_s7 = inlined_call_operand.vmem [shape: f32[8,1], index: 7, kind: output, shape index: {}]  }
   0x1   :  { %v2400_v0 = vld [vmem:[%s3705_s1 + $0x4] ss:$16 sps:$4 sm:$0xff]   ;;  %v2404_v2 = vld [vmem:[%s3705_s1] ss:$16 sps:$4 sm:$0xff]   ;;  %v30_v46 = vld [vmem:[%s3706_s0 + $0x8] sm:$0xff] }
   0x2   :  { %v2402_v1 = vld [vmem:[%s3705_s1 + $0x204] ss:$16 sps:$4 sm:$0xff]   ;;  %1245 = vmatprep.subr.bf16.mxu1 %v2400_v0  ;;  %v2405_v3 = vld [vmem:[%s3705_s1 + $0x200] ss:$16 sps:$4 sm:$0xff]   ;;  %v2979_v48 = vpack.c.bf16 %v30_v46, %v30_v46  ;;  %v32_v49 = vld [vmem:[%s3706_s0 + $0x18] sm:$0xff] }
   0x3   :  { %1286 = vmatprep.subr.bf16.mxu0 %v2402_v1  ;;  %v2406_v4 = vld [vmem:[%s3705_s1 + $0x24] ss:$16 sps:$4 sm:$0xff]   ;;  %1246 = vmatpush1.bf16.msra.mxu1 %v2404_v2  ;;  %v2410_v6 = vld [vmem:[%s3705_s1 + $0x20] ss:$16 sps:$4 sm:$0xff]   ;;  %v2990_v52 = vpack.c.bf16 %v32_v49, %v32_v49  ;;  %v2553_v49 = vld [vmem:[%s3705_s1 + $0x128] ss:$16 sps:$4 sm:$0xff]  }
   0x4   :  { %1287 = vmatpush1.bf16.msra.mxu0 %v2405_v3  ;;  %v2408_v5 = vld [vmem:[%s3705_s1 + $0x224] ss:$16 sps:$4 sm:$0xff]   ;;  %1247 = vmatprep.subr.bf16.mxu1 %v2406_v4  ;;  %v2411_v7 = vld [vmem:[%s3705_s1 + $0x220] ss:$16 sps:$4 sm:$0xff]  }
   0x5   :  { %1288 = vmatprep.subr.bf16.mxu0 %v2408_v5  ;;  %v2412_v8 = vld [vmem:[%s3705_s1 + $0x44] ss:$16 sps:$4 sm:$0xff]   ;;  %v2416_v10 = vld [vmem:[%s3705_s1 + $0x40] ss:$16 sps:$4 sm:$0xff]   ;;  %1277 = vmatprep.mubr.bf16.mxu1 %v2979_v48 }
   0x6   :  { %v2414_v9 = vld [vmem:[%s3705_s1 + $0x244] ss:$16 sps:$4 sm:$0xff]   ;;  %v2417_v11 = vld [vmem:[%s3705_s1 + $0x240] ss:$16 sps:$4 sm:$0xff]   ;;  %1318 = vmatprep.mubr.bf16.mxu0 %v2990_v52 }
   0x7   :  { %1248 = vmatpush1.bf16.msra.mxu1 %v2410_v6  ;;  %v2418_v12 = vld [vmem:[%s3705_s1 + $0x64] ss:$16 sps:$4 sm:$0xff]   ;;  %v2422_v14 = vld [vmem:[%s3705_s1 + $0x60] ss:$16 sps:$4 sm:$0xff]  }
   0x8   :  { %1289 = vmatpush1.bf16.msra.mxu0 %v2411_v7  ;;  %1249 = vmatprep.subr.bf16.mxu1 %v2412_v8  ;;  %v2420_v13 = vld [vmem:[%s3705_s1 + $0x264] ss:$16 sps:$4 sm:$0xff]   ;;  %v2423_v15 = vld [vmem:[%s3705_s1 + $0x260] ss:$16 sps:$4 sm:$0xff]   ;;  %v2501_v7 = vld [vmem:[%s3705_s1 + $0xc] ss:$16 sps:$4 sm:$0xff]  }
   0x9   :  { %1290 = vmatprep.subr.bf16.mxu0 %v2414_v9  ;;  %v2424_v16 = vld [vmem:[%s3705_s1 + $0x84] ss:$16 sps:$4 sm:$0xff]   ;;  %v2428_v18 = vld [vmem:[%s3705_s1 + $0x80] ss:$16 sps:$4 sm:$0xff]  }
   0xa   :  { %v2426_v17 = vld [vmem:[%s3705_s1 + $0x284] ss:$16 sps:$4 sm:$0xff]   ;;  %v2429_v19 = vld [vmem:[%s3705_s1 + $0x280] ss:$16 sps:$4 sm:$0xff]  }
   0xb   :  { %1250 = vmatpush1.bf16.msra.mxu1 %v2416_v10  ;;  %v2430_v20 = vld [vmem:[%s3705_s1 + $0xa4] ss:$16 sps:$4 sm:$0xff]   ;;  %v2434_v22 = vld [vmem:[%s3705_s1 + $0xa0] ss:$16 sps:$4 sm:$0xff]   ;;  %v2499_v10 = vld [vmem:[%s3705_s1 + $0x8] ss:$16 sps:$4 sm:$0xff]  }
   0xc   :  { %1291 = vmatpush1.bf16.msra.mxu0 %v2417_v11  ;;  %1251 = vmatprep.subr.bf16.mxu1 %v2418_v12  ;;  %v2432_v21 = vld [vmem:[%s3705_s1 + $0x2a4] ss:$16 sps:$4 sm:$0xff]   ;;  %v2435_v23 = vld [vmem:[%s3705_s1 + $0x2a0] ss:$16 sps:$4 sm:$0xff]  }
   0xd   :  { %1292 = vmatprep.subr.bf16.mxu0 %v2420_v13  ;;  %v2436_v24 = vld [vmem:[%s3705_s1 + $0xc4] ss:$16 sps:$4 sm:$0xff]   ;;  %v2440_v26 = vld [vmem:[%s3705_s1 + $0xc0] ss:$16 sps:$4 sm:$0xff]   ;;  %v2507_v13 = vld [vmem:[%s3705_s1 + $0x2c] ss:$16 sps:$4 sm:$0xff]  }
   0xe   :  { %v2438_v25 = vld [vmem:[%s3705_s1 + $0x2c4] ss:$16 sps:$4 sm:$0xff]   ;;  %v2441_v27 = vld [vmem:[%s3705_s1 + $0x2c0] ss:$16 sps:$4 sm:$0xff]  }
   0xf   :  { %1252 = vmatpush1.bf16.msra.mxu1 %v2422_v14  ;;  %v2442_v28 = vld [vmem:[%s3705_s1 + $0xe4] ss:$16 sps:$4 sm:$0xff]   ;;  %v2446_v30 = vld [vmem:[%s3705_s1 + $0xe0] ss:$16 sps:$4 sm:$0xff]  }
  0x10   :  { %1293 = vmatpush1.bf16.msra.mxu0 %v2423_v15  ;;  %1253 = vmatprep.subr.bf16.mxu1 %v2424_v16  ;;  %v2444_v29 = vld [vmem:[%s3705_s1 + $0x2e4] ss:$16 sps:$4 sm:$0xff]   ;;  %v2447_v31 = vld [vmem:[%s3705_s1 + $0x2e0] ss:$16 sps:$4 sm:$0xff]   ;;  %v2505_v15 = vld [vmem:[%s3705_s1 + $0x28] ss:$16 sps:$4 sm:$0xff]  }
  0x11   :  { %1294 = vmatprep.subr.bf16.mxu0 %v2426_v17  ;;  %v2448_v32 = vld [vmem:[%s3705_s1 + $0x104] ss:$16 sps:$4 sm:$0xff]   ;;  %v2452_v34 = vld [vmem:[%s3705_s1 + $0x100] ss:$16 sps:$4 sm:$0xff]   ;;  %v2513_v17 = vld [vmem:[%s3705_s1 + $0x4c] ss:$16 sps:$4 sm:$0xff]  }
  0x12   :  { %v2450_v33 = vld [vmem:[%s3705_s1 + $0x304] ss:$16 sps:$4 sm:$0xff]   ;;  %v2453_v35 = vld [vmem:[%s3705_s1 + $0x300] ss:$16 sps:$4 sm:$0xff]  }
  0x13   :  { %1254 = vmatpush1.bf16.msra.mxu1 %v2428_v18  ;;  %v2454_v36 = vld [vmem:[%s3705_s1 + $0x124] ss:$16 sps:$4 sm:$0xff]   ;;  %v2458_v38 = vld [vmem:[%s3705_s1 + $0x120] ss:$16 sps:$4 sm:$0xff]  }
  0x14   :  { %1295 = vmatpush1.bf16.msra.mxu0 %v2429_v19  ;;  %1255 = vmatprep.subr.bf16.mxu1 %v2430_v20  ;;  %v2456_v37 = vld [vmem:[%s3705_s1 + $0x324] ss:$16 sps:$4 sm:$0xff]   ;;  %v2459_v39 = vld [vmem:[%s3705_s1 + $0x320] ss:$16 sps:$4 sm:$0xff]   ;;  %v2511_v19 = vld [vmem:[%s3705_s1 + $0x48] ss:$16 sps:$4 sm:$0xff]  }
  0x15   :  { %1296 = vmatprep.subr.bf16.mxu0 %v2432_v21  ;;  %v2460_v40 = vld [vmem:[%s3705_s1 + $0x144] ss:$16 sps:$4 sm:$0xff]   ;;  %v2464_v42 = vld [vmem:[%s3705_s1 + $0x140] ss:$16 sps:$4 sm:$0xff]   ;;  %v2519_v21 = vld [vmem:[%s3705_s1 + $0x6c] ss:$16 sps:$4 sm:$0xff]  }
  0x16   :  { %v2462_v41 = vld [vmem:[%s3705_s1 + $0x344] ss:$16 sps:$4 sm:$0xff]   ;;  %v2465_v43 = vld [vmem:[%s3705_s1 + $0x340] ss:$16 sps:$4 sm:$0xff]  }
  0x17   :  { %1256 = vmatpush1.bf16.msra.mxu1 %v2434_v22  ;;  %v2466_v44 = vld [vmem:[%s3705_s1 + $0x164] ss:$16 sps:$4 sm:$0xff]   ;;  %v2470_v47 = vld [vmem:[%s3705_s1 + $0x160] ss:$16 sps:$4 sm:$0xff]  }
  0x18   :  { %1297 = vmatpush1.bf16.msra.mxu0 %v2435_v23  ;;  %1257 = vmatprep.subr.bf16.mxu1 %v2436_v24  ;;  %v2468_v45 = vld [vmem:[%s3705_s1 + $0x364] ss:$16 sps:$4 sm:$0xff]   ;;  %v2471_v50 = vld [vmem:[%s3705_s1 + $0x360] ss:$16 sps:$4 sm:$0xff]   ;;  %v2517_v23 = vld [vmem:[%s3705_s1 + $0x68] ss:$16 sps:$4 sm:$0xff]  }
  0x19   :  { %1298 = vmatprep.subr.bf16.mxu0 %v2438_v25  ;;  %v2472_v51 = vld [vmem:[%s3705_s1 + $0x184] ss:$16 sps:$4 sm:$0xff]   ;;  %v2476_v54 = vld [vmem:[%s3705_s1 + $0x180] ss:$16 sps:$4 sm:$0xff]   ;;  %v2525_v25 = vld [vmem:[%s3705_s1 + $0x8c] ss:$16 sps:$4 sm:$0xff]  }
  0x1a   :  { %v2474_v53 = vld [vmem:[%s3705_s1 + $0x384] ss:$16 sps:$4 sm:$0xff]   ;;  %v2477_v55 = vld [vmem:[%s3705_s1 + $0x380] ss:$16 sps:$4 sm:$0xff]  }
  0x1b   :  { %1258 = vmatpush1.bf16.msra.mxu1 %v2440_v26  ;;  %v2478_v56 = vld [vmem:[%s3705_s1 + $0x1a4] ss:$16 sps:$4 sm:$0xff]   ;;  %v2482_v58 = vld [vmem:[%s3705_s1 + $0x1a0] ss:$16 sps:$4 sm:$0xff]  }
  0x1c   :  { %1299 = vmatpush1.bf16.msra.mxu0 %v2441_v27  ;;  %1259 = vmatprep.subr.bf16.mxu1 %v2442_v28  ;;  %v2480_v57 = vld [vmem:[%s3705_s1 + $0x3a4] ss:$16 sps:$4 sm:$0xff]   ;;  %v2483_v59 = vld [vmem:[%s3705_s1 + $0x3a0] ss:$16 sps:$4 sm:$0xff]   ;;  %v2523_v27 = vld [vmem:[%s3705_s1 + $0x88] ss:$16 sps:$4 sm:$0xff]  }
  0x1d   :  { %1300 = vmatprep.subr.bf16.mxu0 %v2444_v29  ;;  %v2484_v60 = vld [vmem:[%s3705_s1 + $0x1c4] ss:$16 sps:$4 sm:$0xff]   ;;  %v2488_v62 = vld [vmem:[%s3705_s1 + $0x1c0] ss:$16 sps:$4 sm:$0xff]   ;;  %v2531_v29 = vld [vmem:[%s3705_s1 + $0xac] ss:$16 sps:$4 sm:$0xff]  }
  0x1e   :  { %v2486_v61 = vld [vmem:[%s3705_s1 + $0x3c4] ss:$16 sps:$4 sm:$0xff]   ;;  %v2489_v63 = vld [vmem:[%s3705_s1 + $0x3c0] ss:$16 sps:$4 sm:$0xff]  }
  0x1f   :  { %1260 = vmatpush1.bf16.msra.mxu1 %v2446_v30  ;;  %v2490_v0 = vld [vmem:[%s3705_s1 + $0x1e4] ss:$16 sps:$4 sm:$0xff]   ;;  %v2494_v2 = vld [vmem:[%s3705_s1 + $0x1e0] ss:$16 sps:$4 sm:$0xff]  }
  0x20   :  { %1301 = vmatpush1.bf16.msra.mxu0 %v2447_v31  ;;  %1261 = vmatprep.subr.bf16.mxu1 %v2448_v32  ;;  %v2492_v1 = vld [vmem:[%s3705_s1 + $0x3e4] ss:$16 sps:$4 sm:$0xff]   ;;  %v2495_v3 = vld [vmem:[%s3705_s1 + $0x3e0] ss:$16 sps:$4 sm:$0xff]   ;;  %v2529_v31 = vld [vmem:[%s3705_s1 + $0xa8] ss:$16 sps:$4 sm:$0xff]  }
  0x21   :  { %1302 = vmatprep.subr.bf16.mxu0 %v2450_v33  ;;  %v29_v4 = vld [vmem:[%s3706_s0] sm:$0xff]  ;;  %v31_v6 = vld [vmem:[%s3706_s0 + $0x10] sm:$0xff]  ;;  %v2537_v33 = vld [vmem:[%s3705_s1 + $0xcc] ss:$16 sps:$4 sm:$0xff]  }
  0x22   :  { %v2498_v5 = vld [vmem:[%s3705_s1 + $0x404] ss:$16 sps:$4 sm:$0xff]   ;;  %v3051_v8 = vpack.c.bf16 %v29_v4, %v29_v4  ;;  %v2496_v9 = vld [vmem:[%s3705_s1 + $0x400] ss:$16 sps:$4 sm:$0xff]   ;;  %v3059_v11 = vpack.c.bf16 %v31_v6, %v31_v6  ;;  %v2585_v4 = vld [vmem:[%s3705_s1 + $0x1cc] ss:$16 sps:$4 sm:$0xff]  }
  0x23   :  { %1262 = vmatpush1.bf16.msra.mxu1 %v2452_v34  ;;  %v2504_v12 = vld [vmem:[%s3705_s1 + $0x424] ss:$16 sps:$4 sm:$0xff]   ;;  %v2502_v14 = vld [vmem:[%s3705_s1 + $0x420] ss:$16 sps:$4 sm:$0xff]   ;;  %v34_v34 = vld [vmem:[%s3706_s0 + $0x28] sm:$0xff] }
  0x24   :  { %1303 = vmatpush1.bf16.msra.mxu0 %v2453_v35  ;;  %1263 = vmatprep.subr.bf16.mxu1 %v2454_v36  ;;  %v2510_v16 = vld [vmem:[%s3705_s1 + $0x444] ss:$16 sps:$4 sm:$0xff]   ;;  %v2508_v18 = vld [vmem:[%s3705_s1 + $0x440] ss:$16 sps:$4 sm:$0xff]   ;;  %v3133_v35 = vpack.c.bf16 %v34_v34, %v34_v34  ;;  %v2583_v6 = vld [vmem:[%s3705_s1 + $0x1c8] ss:$16 sps:$4 sm:$0xff]  }
  0x25   :  { %1304 = vmatprep.subr.bf16.mxu0 %v2456_v37  ;;  %v2516_v20 = vld [vmem:[%s3705_s1 + $0x464] ss:$16 sps:$4 sm:$0xff]   ;;  %v2514_v22 = vld [vmem:[%s3705_s1 + $0x460] ss:$16 sps:$4 sm:$0xff]   ;;  %v2535_v37 = vld [vmem:[%s3705_s1 + $0xc8] ss:$16 sps:$4 sm:$0xff]  }
  0x26   :  { %v2522_v24 = vld [vmem:[%s3705_s1 + $0x484] ss:$16 sps:$4 sm:$0xff]   ;;  %v2520_v26 = vld [vmem:[%s3705_s1 + $0x480] ss:$16 sps:$4 sm:$0xff]  }
  0x27   :  { %1264 = vmatpush1.bf16.msra.mxu1 %v2458_v38  ;;  %v2528_v28 = vld [vmem:[%s3705_s1 + $0x4a4] ss:$16 sps:$4 sm:$0xff]   ;;  %v2526_v30 = vld [vmem:[%s3705_s1 + $0x4a0] ss:$16 sps:$4 sm:$0xff]  }
  0x28   :  { %1305 = vmatpush1.bf16.msra.mxu0 %v2459_v39  ;;  %1265 = vmatprep.subr.bf16.mxu1 %v2460_v40  ;;  %v2534_v32 = vld [vmem:[%s3705_s1 + $0x4c4] ss:$16 sps:$4 sm:$0xff]   ;;  %v2532_v36 = vld [vmem:[%s3705_s1 + $0x4c0] ss:$16 sps:$4 sm:$0xff]   ;;  %v2543_v39 = vld [vmem:[%s3705_s1 + $0xec] ss:$16 sps:$4 sm:$0xff]  }
  0x29   :  { %1306 = vmatprep.subr.bf16.mxu0 %v2462_v41  ;;  %v2540_v38 = vld [vmem:[%s3705_s1 + $0x4e4] ss:$16 sps:$4 sm:$0xff]   ;;  %v2538_v40 = vld [vmem:[%s3705_s1 + $0x4e0] ss:$16 sps:$4 sm:$0xff]   ;;  %v2541_v41 = vld [vmem:[%s3705_s1 + $0xe8] ss:$16 sps:$4 sm:$0xff]  }
  0x2a   :  { %v2552_v46 = vld [vmem:[%s3705_s1 + $0x524] ss:$16 sps:$4 sm:$0xff]  }
  0x2b   :  { %1266 = vmatpush1.bf16.msra.mxu1 %v2464_v42  ;;  %v2546_v42 = vld [vmem:[%s3705_s1 + $0x504] ss:$16 sps:$4 sm:$0xff]  }
  0x2c   :  { %1307 = vmatpush1.bf16.msra.mxu0 %v2465_v43  ;;  %1267 = vmatprep.subr.bf16.mxu1 %v2466_v44  ;;  %v2549_v43 = vld [vmem:[%s3705_s1 + $0x10c] ss:$16 sps:$4 sm:$0xff]   ;;  %v2544_v44 = vld [vmem:[%s3705_s1 + $0x500] ss:$16 sps:$4 sm:$0xff]  }
  0x2d   :  { %1308 = vmatprep.subr.bf16.mxu0 %v2468_v45  ;;  %v2547_v45 = vld [vmem:[%s3705_s1 + $0x108] ss:$16 sps:$4 sm:$0xff]   ;;  %v2696_v34 = vld [vmem:[%s3707_s3 + $0x4] ss:$8 sps:$4 sm:$0xff]  }
  0x2f   :  { %1268 = vmatpush1.bf16.msra.mxu1 %v2470_v47  ;;  %v2555_v47 = vld [vmem:[%s3705_s1 + $0x12c] ss:$16 sps:$4 sm:$0xff]  }
  0x30   :  { %1309 = vmatpush1.bf16.msra.mxu0 %v2471_v50  ;;  %1269 = vmatprep.subr.bf16.mxu1 %v2472_v51  ;;  %v2558_v50 = vld [vmem:[%s3705_s1 + $0x544] ss:$16 sps:$4 sm:$0xff]   ;;  %v2561_v51 = vld [vmem:[%s3705_s1 + $0x14c] ss:$16 sps:$4 sm:$0xff]  }
  0x31   :  { %1310 = vmatprep.subr.bf16.mxu0 %v2474_v53  ;;  %v2556_v53 = vld [vmem:[%s3705_s1 + $0x540] ss:$16 sps:$4 sm:$0xff]  }
  0x33   :  { %1270 = vmatpush1.bf16.msra.mxu1 %v2476_v54  ;;  %v2559_v54 = vld [vmem:[%s3705_s1 + $0x148] ss:$16 sps:$4 sm:$0xff]  }
  0x34   :  { %1311 = vmatpush1.bf16.msra.mxu0 %v2477_v55  ;;  %1271 = vmatprep.subr.bf16.mxu1 %v2478_v56  ;;  %v2564_v55 = vld [vmem:[%s3705_s1 + $0x564] ss:$16 sps:$4 sm:$0xff]   ;;  %v2567_v56 = vld [vmem:[%s3705_s1 + $0x16c] ss:$16 sps:$4 sm:$0xff]  }
  0x35   :  { %1312 = vmatprep.subr.bf16.mxu0 %v2480_v57  ;;  %v2562_v57 = vld [vmem:[%s3705_s1 + $0x560] ss:$16 sps:$4 sm:$0xff]  }
  0x37   :  { %1272 = vmatpush1.bf16.msra.mxu1 %v2482_v58  ;;  %v2565_v58 = vld [vmem:[%s3705_s1 + $0x168] ss:$16 sps:$4 sm:$0xff]  }
  0x38   :  { %1313 = vmatpush1.bf16.msra.mxu0 %v2483_v59  ;;  %1273 = vmatprep.subr.bf16.mxu1 %v2484_v60  ;;  %v2570_v59 = vld [vmem:[%s3705_s1 + $0x584] ss:$16 sps:$4 sm:$0xff]   ;;  %v2573_v60 = vld [vmem:[%s3705_s1 + $0x18c] ss:$16 sps:$4 sm:$0xff]  }
  0x39   :  { %1314 = vmatprep.subr.bf16.mxu0 %v2486_v61  ;;  %v2568_v61 = vld [vmem:[%s3705_s1 + $0x580] ss:$16 sps:$4 sm:$0xff]  }
  0x3b   :  { %1274 = vmatpush1.bf16.msra.mxu1 %v2488_v62  ;;  %v2571_v62 = vld [vmem:[%s3705_s1 + $0x188] ss:$16 sps:$4 sm:$0xff]  }
  0x3c   :  { %1315 = vmatpush1.bf16.msra.mxu0 %v2489_v63  ;;  %1275 = vmatprep.subr.bf16.mxu1 %v2490_v0  ;;  %v2576_v63 = vld [vmem:[%s3705_s1 + $0x5a4] ss:$16 sps:$4 sm:$0xff]   ;;  %v2579_v0 = vld [vmem:[%s3705_s1 + $0x1ac] ss:$16 sps:$4 sm:$0xff]  }
  0x3d   :  { %1316 = vmatprep.subr.bf16.mxu0 %v2492_v1  ;;  %v2574_v1 = vld [vmem:[%s3705_s1 + $0x5a0] ss:$16 sps:$4 sm:$0xff]  }
  0x3f   :  { %1276 = vmatpush1.bf16.msra.mxu1 %v2494_v2  ;;  %v2577_v2 = vld [vmem:[%s3705_s1 + $0x1a8] ss:$16 sps:$4 sm:$0xff]  }
  0x40   :  { %1317 = vmatpush1.bf16.msra.mxu0 %v2495_v3  ;;  %1409 = vmatprep.subr.bf16.mxu1 %v2501_v7  ;;  %v2582_v3 = vld [vmem:[%s3705_s1 + $0x5c4] ss:$16 sps:$4 sm:$0xff]  }
  0x41   :  { %1327 = vmatprep.subr.bf16.mxu0 %v2498_v5  ;;  %v2580_v5 = vld [vmem:[%s3705_s1 + $0x5c0] ss:$16 sps:$4 sm:$0xff]   ;;  %v2588_v7 = vld [vmem:[%s3705_s1 + $0x5e4] ss:$16 sps:$4 sm:$0xff]  }
  0x42   :  { %1278 = vmatmul.mubr.bf16.vlgmr.msra.gmra.mrb[0].mxu1 %v3051_v8 }
  0x43   :  { %1319 = vmatmul.mubr.bf16.vlgmr.msra.gmra.mrb[0].mxu0 %v3059_v11  ;;  %1410 = vmatpush1.bf16.msra.mxu1 %v2499_v10  ;;  %v2586_v10 = vld [vmem:[%s3705_s1 + $0x5e0] ss:$16 sps:$4 sm:$0xff]  }
  0x44   :  { %1328 = vmatpush1.bf16.msra.mxu0 %v2496_v9  ;;  %1411 = vmatprep.subr.bf16.mxu1 %v2507_v13  ;;  %v2591_v9 = vld [vmem:[%s3705_s1 + $0x1ec] ss:$16 sps:$4 sm:$0xff]   ;;  %v33_v13 = vld [vmem:[%s3706_s0 + $0x20] sm:$0xff] }
  0x45   :  { %1329 = vmatprep.subr.bf16.mxu0 %v2504_v12  ;;  %1441 = vmatprep.mubr.bf16.mxu1 %v2979_v48  ;;  %v2550_v48 = vld [vmem:[%s3705_s1 + $0x520] ss:$16 sps:$4 sm:$0xff]   ;;  %v2589_v12 = vld [vmem:[%s3705_s1 + $0x1e8] ss:$16 sps:$4 sm:$0xff]  }
  0x46   :  { %1359 = vmatprep.mubr.bf16.mxu0 %v3133_v35 }
  0x47   :  { %1412 = vmatpush1.bf16.msra.mxu1 %v2505_v15  ;;  %v2600_v15 = vld [vmem:[%s3705_s1 + $0x604] ss:$16 sps:$4 sm:$0xff]  }
  0x48   :  { %1330 = vmatpush1.bf16.msra.mxu0 %v2502_v14  ;;  %1413 = vmatprep.subr.bf16.mxu1 %v2513_v17  ;;  %v2594_v14 = vld [vmem:[%s3705_s1 + $0x20c] ss:$16 sps:$4 sm:$0xff]   ;;  %v2592_v17 = vld [vmem:[%s3705_s1 + $0x208] ss:$16 sps:$4 sm:$0xff]  }
  0x49   :  { %1331 = vmatprep.subr.bf16.mxu0 %v2510_v16  ;;  %v3259_v16 = vpack.c.bf16 %v33_v13, %v33_v13  ;;  %v2648_v13 = vld [vmem:[%s3705_s1 + $0x42c] ss:$16 sps:$4 sm:$0xff]  }
  0x4b   :  { %1414 = vmatpush1.bf16.msra.mxu1 %v2511_v19  ;;  %v2597_v19 = vld [vmem:[%s3705_s1 + $0x22c] ss:$16 sps:$4 sm:$0xff]  }
  0x4c   :  { %1332 = vmatpush1.bf16.msra.mxu0 %v2508_v18  ;;  %1415 = vmatprep.subr.bf16.mxu1 %v2519_v21  ;;  %v2598_v18 = vld [vmem:[%s3705_s1 + $0x600] ss:$16 sps:$4 sm:$0xff]   ;;  %v2603_v21 = vld [vmem:[%s3705_s1 + $0x24c] ss:$16 sps:$4 sm:$0xff]  }
  0x4d   :  { %1333 = vmatprep.subr.bf16.mxu0 %v2516_v20  ;;  %v2595_v20 = vld [vmem:[%s3705_s1 + $0x228] ss:$16 sps:$4 sm:$0xff]  }
  0x4f   :  { %1416 = vmatpush1.bf16.msra.mxu1 %v2517_v23  ;;  %v35_v23 = vld [vmem:[%s3706_s0 + $0x30] sm:$0xff] }
  0x50   :  { %1334 = vmatpush1.bf16.msra.mxu0 %v2514_v22  ;;  %1417 = vmatprep.subr.bf16.mxu1 %v2525_v25  ;;  %v2794_v22 = vmov 0   ;;  %v3289_v25 = vpack.c.bf16 %v35_v23, %v35_v23  ;;  %v2652_v23 = vld [vmem:[%s3705_s1 + $0x468] ss:$16 sps:$4 sm:$0xff]  }
  0x51   :  { %1335 = vmatprep.subr.bf16.mxu0 %v2522_v24  ;;  %v2606_v24 = vld [vmem:[%s3705_s1 + $0x26c] ss:$16 sps:$4 sm:$0xff]  }
  0x53   :  { %1418 = vmatpush1.bf16.msra.mxu1 %v2523_v27  ;;  %v2607_v27 = vld [vmem:[%s3705_s1 + $0x288] ss:$16 sps:$4 sm:$0xff]  }
  0x54   :  { %1336 = vmatpush1.bf16.msra.mxu0 %v2520_v26  ;;  %1419 = vmatprep.subr.bf16.mxu1 %v2531_v29  ;;  %v2609_v26 = vld [vmem:[%s3705_s1 + $0x28c] ss:$16 sps:$4 sm:$0xff]   ;;  %v2610_v29 = vld [vmem:[%s3705_s1 + $0x2a8] ss:$16 sps:$4 sm:$0xff]  }
  0x55   :  { %1337 = vmatprep.subr.bf16.mxu0 %v2528_v28  ;;  %v2612_v28 = vld [vmem:[%s3705_s1 + $0x2ac] ss:$16 sps:$4 sm:$0xff]  }
  0x57   :  { %1420 = vmatpush1.bf16.msra.mxu1 %v2529_v31  ;;  %v2613_v31 = vld [vmem:[%s3705_s1 + $0x2c8] ss:$16 sps:$4 sm:$0xff]  }
  0x58   :  { %1338 = vmatpush1.bf16.msra.mxu0 %v2526_v30  ;;  %1421 = vmatprep.subr.bf16.mxu1 %v2537_v33  ;;  %v2615_v30 = vld [vmem:[%s3705_s1 + $0x2cc] ss:$16 sps:$4 sm:$0xff]   ;;  %v2694_v33 = vld [vmem:[%s3707_s3] ss:$8 sps:$4 sm:$0xff]  }
  0x59   :  { %1339 = vmatprep.subr.bf16.mxu0 %v2534_v32  ;;  %v2618_v32 = vld [vmem:[%s3705_s1 + $0x2ec] ss:$16 sps:$4 sm:$0xff]  }
  0x5b   :  { %1422 = vmatpush1.bf16.msra.mxu1 %v2535_v37  ;;  %v2699_v37 = vld [vmem:[%s3707_s3 + $0x14] ss:$8 sps:$4 sm:$0xff]  }
  0x5c   :  { %1340 = vmatpush1.bf16.msra.mxu0 %v2532_v36  ;;  %1423 = vmatprep.subr.bf16.mxu1 %v2543_v39  ;;  %v2616_v36 = vld [vmem:[%s3705_s1 + $0x2e8] ss:$16 sps:$4 sm:$0xff]  }
  0x5d   :  { %1341 = vmatprep.subr.bf16.mxu0 %v2540_v38  ;;  %v2621_v38 = vld [vmem:[%s3705_s1 + $0x30c] ss:$16 sps:$4 sm:$0xff]   ;;  %v2697_v39 = vld [vmem:[%s3707_s3 + $0x10] ss:$8 sps:$4 sm:$0xff]  }
  0x5f   :  { %1424 = vmatpush1.bf16.msra.mxu1 %v2541_v41  ;;  %v2619_v41 = vld [vmem:[%s3705_s1 + $0x308] ss:$16 sps:$4 sm:$0xff]  }
  0x60   :  { %1342 = vmatpush1.bf16.msra.mxu0 %v2538_v40  ;;  %1425 = vmatprep.subr.bf16.mxu1 %v2549_v43  ;;  %v2702_v40 = vld [vmem:[%s3707_s3 + $0x24] ss:$8 sps:$4 sm:$0xff]   ;;  %v2700_v43 = vld [vmem:[%s3707_s3 + $0x20] ss:$8 sps:$4 sm:$0xff]  }
  0x61   :  { %1343 = vmatprep.subr.bf16.mxu0 %v2546_v42  ;;  %v2624_v42 = vld [vmem:[%s3705_s1 + $0x32c] ss:$16 sps:$4 sm:$0xff]  }
  0x63   :  { %1426 = vmatpush1.bf16.msra.mxu1 %v2547_v45  ;;  %v2622_v45 = vld [vmem:[%s3705_s1 + $0x328] ss:$16 sps:$4 sm:$0xff]  }
  0x64   :  { %1344 = vmatpush1.bf16.msra.mxu0 %v2544_v44  ;;  %1427 = vmatprep.subr.bf16.mxu1 %v2555_v47  ;;  %v2705_v44 = vld [vmem:[%s3707_s3 + $0x34] ss:$8 sps:$4 sm:$0xff]   ;;  %v2703_v47 = vld [vmem:[%s3707_s3 + $0x30] ss:$8 sps:$4 sm:$0xff]  }
  0x65   :  { %1345 = vmatprep.subr.bf16.mxu0 %v2552_v46  ;;  %v2627_v46 = vld [vmem:[%s3705_s1 + $0x34c] ss:$16 sps:$4 sm:$0xff]  }
  0x67   :  { %1428 = vmatpush1.bf16.msra.mxu1 %v2553_v49  ;;  %v2625_v49 = vld [vmem:[%s3705_s1 + $0x348] ss:$16 sps:$4 sm:$0xff]  }
  0x68   :  { %1346 = vmatpush1.bf16.msra.mxu0 %v2550_v48  ;;  %1429 = vmatprep.subr.bf16.mxu1 %v2561_v51  ;;  %v2708_v48 = vld [vmem:[%s3707_s3 + $0x44] ss:$8 sps:$4 sm:$0xff]   ;;  %v2628_v51 = vld [vmem:[%s3705_s1 + $0x368] ss:$16 sps:$4 sm:$0xff]  }
  0x69   :  { %1347 = vmatprep.subr.bf16.mxu0 %v2558_v50  ;;  %v2630_v50 = vld [vmem:[%s3705_s1 + $0x36c] ss:$16 sps:$4 sm:$0xff]  }
  0x6b   :  { %1430 = vmatpush1.bf16.msra.mxu1 %v2559_v54  ;;  %v2711_v54 = vld [vmem:[%s3707_s3 + $0x54] ss:$8 sps:$4 sm:$0xff]  }
  0x6c   :  { %1348 = vmatpush1.bf16.msra.mxu0 %v2556_v53  ;;  %1431 = vmatprep.subr.bf16.mxu1 %v2567_v56  ;;  %v2706_v53 = vld [vmem:[%s3707_s3 + $0x40] ss:$8 sps:$4 sm:$0xff]   ;;  %v2709_v56 = vld [vmem:[%s3707_s3 + $0x50] ss:$8 sps:$4 sm:$0xff]  }
  0x6d   :  { %1349 = vmatprep.subr.bf16.mxu0 %v2564_v55  ;;  %v2633_v55 = vld [vmem:[%s3705_s1 + $0x38c] ss:$16 sps:$4 sm:$0xff]  }
  0x6f   :  { %1432 = vmatpush1.bf16.msra.mxu1 %v2565_v58  ;;  %v2631_v58 = vld [vmem:[%s3705_s1 + $0x388] ss:$16 sps:$4 sm:$0xff]  }
  0x70   :  { %1350 = vmatpush1.bf16.msra.mxu0 %v2562_v57  ;;  %1433 = vmatprep.subr.bf16.mxu1 %v2573_v60  ;;  %v2714_v57 = vld [vmem:[%s3707_s3 + $0x64] ss:$8 sps:$4 sm:$0xff]   ;;  %v2712_v60 = vld [vmem:[%s3707_s3 + $0x60] ss:$8 sps:$4 sm:$0xff]  }
  0x71   :  { %1351 = vmatprep.subr.bf16.mxu0 %v2570_v59  ;;  %v2636_v59 = vld [vmem:[%s3705_s1 + $0x3ac] ss:$16 sps:$4 sm:$0xff]  }
  0x73   :  { %1434 = vmatpush1.bf16.msra.mxu1 %v2571_v62  ;;  %v2634_v62 = vld [vmem:[%s3705_s1 + $0x3a8] ss:$16 sps:$4 sm:$0xff]  }
  0x74   :  { %1352 = vmatpush1.bf16.msra.mxu0 %v2568_v61  ;;  %1435 = vmatprep.subr.bf16.mxu1 %v2579_v0  ;;  %v2717_v61 = vld [vmem:[%s3707_s3 + $0x74] ss:$8 sps:$4 sm:$0xff]   ;;  %v2715_v0 = vld [vmem:[%s3707_s3 + $0x70] ss:$8 sps:$4 sm:$0xff]  }
  0x75   :  { %1353 = vmatprep.subr.bf16.mxu0 %v2576_v63  ;;  %v2639_v63 = vld [vmem:[%s3705_s1 + $0x3cc] ss:$16 sps:$4 sm:$0xff]  }
  0x77   :  { %1436 = vmatpush1.bf16.msra.mxu1 %v2577_v2  ;;  %v2637_v2 = vld [vmem:[%s3705_s1 + $0x3c8] ss:$16 sps:$4 sm:$0xff]  }
  0x78   :  { %1354 = vmatpush1.bf16.msra.mxu0 %v2574_v1  ;;  %1437 = vmatprep.subr.bf16.mxu1 %v2585_v4  ;;  %v2720_v1 = vld [vmem:[%s3707_s3 + $0x84] ss:$8 sps:$4 sm:$0xff]   ;;  %v2718_v4 = vld [vmem:[%s3707_s3 + $0x80] ss:$8 sps:$4 sm:$0xff]  }
  0x79   :  { %1355 = vmatprep.subr.bf16.mxu0 %v2582_v3  ;;  %v2642_v3 = vld [vmem:[%s3705_s1 + $0x3ec] ss:$16 sps:$4 sm:$0xff]  }
  0x7b   :  { %1438 = vmatpush1.bf16.msra.mxu1 %v2583_v6  ;;  %v2640_v6 = vld [vmem:[%s3705_s1 + $0x3e8] ss:$16 sps:$4 sm:$0xff]  }
  0x7c   :  { %1356 = vmatpush1.bf16.msra.mxu0 %v2580_v5  ;;  %1439 = vmatprep.subr.bf16.mxu1 %v2591_v9  ;;  %v2723_v5 = vld [vmem:[%s3707_s3 + $0x94] ss:$8 sps:$4 sm:$0xff]   ;;  %v2721_v9 = vld [vmem:[%s3707_s3 + $0x90] ss:$8 sps:$4 sm:$0xff]  }
  0x7d   :  { %1357 = vmatprep.subr.bf16.mxu0 %v2588_v7  ;;  %v2645_v7 = vld [vmem:[%s3705_s1 + $0x40c] ss:$16 sps:$4 sm:$0xff]  }
  0x7f   :  { %1440 = vmatpush1.bf16.msra.mxu1 %v2589_v12  ;;  %v2643_v12 = vld [vmem:[%s3705_s1 + $0x408] ss:$16 sps:$4 sm:$0xff]  }
  0x80   :  { %1358 = vmatpush1.bf16.msra.mxu0 %v2586_v10  ;;  %1450 = vmatprep.subr.bf16.mxu1 %v2594_v14  ;;  %v2726_v10 = vld [vmem:[%s3707_s3 + $0xa4] ss:$8 sps:$4 sm:$0xff]   ;;  %v2724_v14 = vld [vmem:[%s3707_s3 + $0xa0] ss:$8 sps:$4 sm:$0xff]  }
  0x81   :  { %1368 = vmatprep.subr.bf16.mxu0 %v2600_v15  ;;  %v2729_v15 = vld [vmem:[%s3707_s3 + $0xb4] ss:$8 sps:$4 sm:$0xff]  }
  0x82   :  { %1442 = vmatmul.mubr.bf16.vlgmr.msra.gmra.mrb[4].mxu1 %v3051_v8  ;;  %v2601_v8 = vld [vmem:[%s3705_s1 + $0x248] ss:$16 sps:$4 sm:$0xff]  }
  0x83   :  { %1360 = vmatmul.mubr.bf16.vlgmr.msra.gmra.mrb[0].mxu0 %v3259_v16  ;;  %1451 = vmatpush1.bf16.msra.mxu1 %v2592_v17  ;;  %v2646_v17 = vld [vmem:[%s3705_s1 + $0x428] ss:$16 sps:$4 sm:$0xff]  }
  0x84   :  { %1369 = vmatpush1.bf16.msra.mxu0 %v2598_v18  ;;  %1452 = vmatprep.subr.bf16.mxu1 %v2597_v19  ;;  %v2651_v18 = vld [vmem:[%s3705_s1 + $0x44c] ss:$16 sps:$4 sm:$0xff]  }
  0x85   :  { %1400 = vmatprep.mubr.bf16.mxu0 %v2794_v22  ;;  %1482 = vmatprep.mubr.bf16.mxu1 %v2990_v52  ;;  %v2604_v52 = vld [vmem:[%s3705_s1 + $0x268] ss:$16 sps:$4 sm:$0xff]   ;;  %v2732_v19 = vld [vmem:[%s3707_s3 + $0xc4] ss:$8 sps:$4 sm:$0xff]  }
  0x86   :  { %1981 = vmatprep.subr.bf16.mxu0 %v2696_v34  ;;  %v2667_v34 = vld [vmem:[%s3705_s1 + $0x508] ss:$16 sps:$4 sm:$0xff]  }
  0x87   :  { %1453 = vmatpush1.bf16.msra.mxu1 %v2595_v20  ;;  %v2654_v20 = vld [vmem:[%s3705_s1 + $0x46c] ss:$16 sps:$4 sm:$0xff]  }
  0x88   :  { %1454 = vmatprep.subr.bf16.mxu1 %v2603_v21  ;;  %v2730_v21 = vld [vmem:[%s3707_s3 + $0xc0] ss:$8 sps:$4 sm:$0xff]  }
  0x8b   :  { %1455 = vmatpush1.bf16.msra.mxu1 %v2601_v8  ;;  %v2735_v8 = vld [vmem:[%s3707_s3 + $0xd4] ss:$8 sps:$4 sm:$0xff]  }
  0x8c   :  { %1456 = vmatprep.subr.bf16.mxu1 %v2606_v24  ;;  %v2657_v24 = vld [vmem:[%s3705_s1 + $0x48c] ss:$16 sps:$4 sm:$0xff]  }
  0x8f   :  { %2300 = vmatmul.mubr.msk.bf16.vlgmr.msra.gmra.mrb[0].mxu0 %vm1241_vm0, %v3289_v25  ;;  %1457 = vmatpush1.bf16.msra.mxu1 %v2604_v52  ;;  %v2733_v52 = vld [vmem:[%s3707_s3 + $0xd0] ss:$8 sps:$4 sm:$0xff]  }
  0x90   :  { %1458 = vmatprep.subr.bf16.mxu1 %v2609_v26  ;;  %1982 = vmatpush1.bf16.msra.mxu0 %v2694_v33  ;;  %v2655_v26 = vld [vmem:[%s3705_s1 + $0x488] ss:$16 sps:$4 sm:$0xff]   ;;  %v2669_v33 = vld [vmem:[%s3705_s1 + $0x50c] ss:$16 sps:$4 sm:$0xff]  }
  0x91   :  { %1983 = vmatprep.subr.bf16.mxu0 %v2699_v37  ;;  %v2738_v37 = vld [vmem:[%s3707_s3 + $0xe4] ss:$8 sps:$4 sm:$0xff]  }
  0x93   :  { %1459 = vmatpush1.bf16.msra.mxu1 %v2607_v27  ;;  %v2660_v27 = vld [vmem:[%s3705_s1 + $0x4ac] ss:$16 sps:$4 sm:$0xff]  }
  0x94   :  { %1460 = vmatprep.subr.bf16.mxu1 %v2612_v28  ;;  %1984 = vmatpush1.bf16.msra.mxu0 %v2697_v39  ;;  %v2658_v28 = vld [vmem:[%s3705_s1 + $0x4a8] ss:$16 sps:$4 sm:$0xff]  }
  0x95   :  { %1985 = vmatprep.subr.bf16.mxu0 %v2702_v40  ;;  %v2736_v39 = vld [vmem:[%s3707_s3 + $0xe0] ss:$8 sps:$4 sm:$0xff]   ;;  %v2675_v40 = vld [vmem:[%s3705_s1 + $0x54c] ss:$16 sps:$4 sm:$0xff]  }
  0x97   :  { %1461 = vmatpush1.bf16.msra.mxu1 %v2610_v29  ;;  %v2663_v29 = vld [vmem:[%s3705_s1 + $0x4cc] ss:$16 sps:$4 sm:$0xff]  }
  0x98   :  { %1462 = vmatprep.subr.bf16.mxu1 %v2615_v30  ;;  %1986 = vmatpush1.bf16.msra.mxu0 %v2700_v43  ;;  %v2661_v30 = vld [vmem:[%s3705_s1 + $0x4c8] ss:$16 sps:$4 sm:$0xff]  }
  0x99   :  { %1987 = vmatprep.subr.bf16.mxu0 %v2705_v44  ;;  %v2739_v43 = vld [vmem:[%s3707_s3 + $0xf0] ss:$8 sps:$4 sm:$0xff]   ;;  %v2678_v44 = vld [vmem:[%s3705_s1 + $0x56c] ss:$16 sps:$4 sm:$0xff]  }
  0x9b   :  { %1463 = vmatpush1.bf16.msra.mxu1 %v2613_v31  ;;  %v2666_v31 = vld [vmem:[%s3705_s1 + $0x4ec] ss:$16 sps:$4 sm:$0xff]  }
  0x9c   :  { %1464 = vmatprep.subr.bf16.mxu1 %v2618_v32  ;;  %1988 = vmatpush1.bf16.msra.mxu0 %v2703_v47  ;;  %v2664_v32 = vld [vmem:[%s3705_s1 + $0x4e8] ss:$16 sps:$4 sm:$0xff]   ;;  %v2744_v47 = vld [vmem:[%s3707_s3 + $0x104] ss:$8 sps:$4 sm:$0xff]  }
  0x9d   :  { %1989 = vmatprep.subr.bf16.mxu0 %v2708_v48  ;;  %v2679_v48 = vld [vmem:[%s3705_s1 + $0x588] ss:$16 sps:$4 sm:$0xff]  }
  0x9f   :  { %1465 = vmatpush1.bf16.msra.mxu1 %v2616_v36  ;;  %v2672_v36 = vld [vmem:[%s3705_s1 + $0x52c] ss:$16 sps:$4 sm:$0xff]  }
  0xa0   :  { %1466 = vmatprep.subr.bf16.mxu1 %v2621_v38  ;;  %1990 = vmatpush1.bf16.msra.mxu0 %v2706_v53  ;;  %v2670_v38 = vld [vmem:[%s3705_s1 + $0x528] ss:$16 sps:$4 sm:$0xff]  }
  0xa1   :  { %1991 = vmatprep.subr.bf16.mxu0 %v2711_v54  ;;  %v2685_v53 = vld [vmem:[%s3705_s1 + $0x5c8] ss:$16 sps:$4 sm:$0xff]   ;;  %v2690_v54 = vld [vmem:[%s3705_s1 + $0x5ec] ss:$16 sps:$4 sm:$0xff]  }
  0xa3   :  { %1467 = vmatpush1.bf16.msra.mxu1 %v2619_v41  ;;  %v2741_v41 = vld [vmem:[%s3707_s3 + $0xf4] ss:$8 sps:$4 sm:$0xff]  }
  0xa4   :  { %1468 = vmatprep.subr.bf16.mxu1 %v2624_v42  ;;  %1992 = vmatpush1.bf16.msra.mxu0 %v2709_v56  ;;  %v2673_v42 = vld [vmem:[%s3705_s1 + $0x548] ss:$16 sps:$4 sm:$0xff]   ;;  %v2693_v56 = vld [vmem:[%s3705_s1 + $0x60c] ss:$16 sps:$4 sm:$0xff]  }
  0xa5   :  { %1993 = vmatprep.subr.bf16.mxu0 %v2714_v57  ;;  %v2691_v57 = vld [vmem:[%s3705_s1 + $0x608] ss:$16 sps:$4 sm:$0xff]  }
  0xa7   :  { %1469 = vmatpush1.bf16.msra.mxu1 %v2622_v45  ;;  %v2676_v45 = vld [vmem:[%s3705_s1 + $0x568] ss:$16 sps:$4 sm:$0xff]  }
  0xa8   :  { %1470 = vmatprep.subr.bf16.mxu1 %v2627_v46  ;;  %1994 = vmatpush1.bf16.msra.mxu0 %v2712_v60  ;;  %v2681_v46 = vld [vmem:[%s3705_s1 + $0x58c] ss:$16 sps:$4 sm:$0xff]  }
  0xa9   :  { %1995 = vmatprep.subr.bf16.mxu0 %v2717_v61 }
  0xab   :  { %1471 = vmatpush1.bf16.msra.mxu1 %v2625_v49  ;;  %v2684_v49 = vld [vmem:[%s3705_s1 + $0x5ac] ss:$16 sps:$4 sm:$0xff]  }
  0xac   :  { %1472 = vmatprep.subr.bf16.mxu1 %v2630_v50  ;;  %1996 = vmatpush1.bf16.msra.mxu0 %v2715_v0  ;;  %v2682_v50 = vld [vmem:[%s3705_s1 + $0x5a8] ss:$16 sps:$4 sm:$0xff]  }
  0xad   :  { %1997 = vmatprep.subr.bf16.mxu0 %v2720_v1 }
  0xaf   :  { %1473 = vmatpush1.bf16.msra.mxu1 %v2628_v51  ;;  %v2687_v51 = vld [vmem:[%s3705_s1 + $0x5cc] ss:$16 sps:$4 sm:$0xff]  }
  0xb0   :  { %1474 = vmatprep.subr.bf16.mxu1 %v2633_v55  ;;  %1998 = vmatpush1.bf16.msra.mxu0 %v2718_v4  ;;  %v2688_v55 = vld [vmem:[%s3705_s1 + $0x5e8] ss:$16 sps:$4 sm:$0xff]  }
  0xb1   :  { %1999 = vmatprep.subr.bf16.mxu0 %v2723_v5 }
  0xb3   :  { %1475 = vmatpush1.bf16.msra.mxu1 %v2631_v58 }
  0xb4   :  { %1476 = vmatprep.subr.bf16.mxu1 %v2636_v59  ;;  %2000 = vmatpush1.bf16.msra.mxu0 %v2721_v9 }
  0xb5   :  { %2001 = vmatprep.subr.bf16.mxu0 %v2726_v10 }
  0xb7   :  { %1477 = vmatpush1.bf16.msra.mxu1 %v2634_v62  ;;  %v241_v62 = vlaneseq }
  0xb8   :  { %1478 = vmatprep.subr.bf16.mxu1 %v2639_v63  ;;  %2002 = vmatpush1.bf16.msra.mxu0 %v2724_v14 }
  0xb9   :  { %2003 = vmatprep.subr.bf16.mxu0 %v2729_v15  ;;  %v3575_v63 = vshrl.u32 %v241_v62, 7 }
  0xbb   :  { %1479 = vmatpush1.bf16.msra.mxu1 %v2637_v2  ;;  %v3578_v0 = vsub.s32 0, %v3575_v63 }
  0xbc   :  { %1480 = vmatprep.subr.bf16.mxu1 %v2642_v3 }
  0xbf   :  { %1481 = vmatpush1.bf16.msra.mxu1 %v2640_v6 }
  0xc0   :  { %1491 = vmatprep.subr.bf16.mxu1 %v2645_v7 }
  0xc2   :  { %1483 = vmatmul.mubr.bf16.vlgmr.msra.gmra.mrb[4].mxu1 %v3059_v11  ;;  %v2727_v11 = vld [vmem:[%s3707_s3 + $0xb0] ss:$8 sps:$4 sm:$0xff]  }
  0xc3   :  { %1492 = vmatpush1.bf16.msra.mxu1 %v2643_v12  ;;  %1523 = vmatprep.mubr.bf16.mxu1 %v3133_v35  ;;  %v2649_v35 = vld [vmem:[%s3705_s1 + $0x448] ss:$16 sps:$4 sm:$0xff]  }
  0xc4   :  { %1493 = vmatprep.subr.bf16.mxu1 %v2648_v13  ;;  %2004 = vmatpush1.bf16.msra.mxu0 %v2727_v11 }
  0xc5   :  { %2005 = vmatprep.subr.bf16.mxu0 %v2732_v19  ;;  %v2747_v19 = vld [vmem:[%s3707_s3 + $0x114] ss:$8 sps:$4 sm:$0xff]  }
  0xc7   :  { %1494 = vmatpush1.bf16.msra.mxu1 %v2646_v17 }
  0xc8   :  { %1495 = vmatprep.subr.bf16.mxu1 %v2651_v18  ;;  %2006 = vmatpush1.bf16.msra.mxu0 %v2730_v21  ;;  %v2742_v18 = vld [vmem:[%s3707_s3 + $0x100] ss:$8 sps:$4 sm:$0xff]  }
  0xc9   :  { %2007 = vmatprep.subr.bf16.mxu0 %v2735_v8  ;;  %v2748_v21 = vld [vmem:[%s3707_s3 + $0x120] ss:$8 sps:$4 sm:$0xff]   ;;  %v2753_v8 = vld [vmem:[%s3707_s3 + $0x134] ss:$8 sps:$4 sm:$0xff]  }
  0xcb   :  { %1496 = vmatpush1.bf16.msra.mxu1 %v2649_v35  ;;  %v2745_v35 = vld [vmem:[%s3707_s3 + $0x110] ss:$8 sps:$4 sm:$0xff]  }
  0xcc   :  { %1497 = vmatprep.subr.bf16.mxu1 %v2654_v20  ;;  %2008 = vmatpush1.bf16.msra.mxu0 %v2733_v52  ;;  %v2750_v20 = vld [vmem:[%s3707_s3 + $0x124] ss:$8 sps:$4 sm:$0xff]   ;;  %v2754_v52 = vld [vmem:[%s3707_s3 + $0x140] ss:$8 sps:$4 sm:$0xff]  }
  0xcd   :  { %2009 = vmatprep.subr.bf16.mxu0 %v2738_v37  ;;  %v2774_v37 = vld [vmem:[%s3707_s3 + $0x1a4] ss:$8 sps:$4 sm:$0xff]  }
  0xcf   :  { %1498 = vmatpush1.bf16.msra.mxu1 %v2652_v23  ;;  %v2751_v23 = vld [vmem:[%s3707_s3 + $0x130] ss:$8 sps:$4 sm:$0xff]  }
  0xd0   :  { %1499 = vmatprep.subr.bf16.mxu1 %v2657_v24  ;;  %2010 = vmatpush1.bf16.msra.mxu0 %v2736_v39  ;;  %v2756_v24 = vld [vmem:[%s3707_s3 + $0x144] ss:$8 sps:$4 sm:$0xff]   ;;  %v2777_v39 = vld [vmem:[%s3707_s3 + $0x1b4] ss:$8 sps:$4 sm:$0xff]  }
  0xd1   :  { %2011 = vmatprep.subr.bf16.mxu0 %v2741_v41  ;;  %v2780_v41 = vld [vmem:[%s3707_s3 + $0x1c4] ss:$8 sps:$4 sm:$0xff]  }
  0xd3   :  { %1500 = vmatpush1.bf16.msra.mxu1 %v2655_v26  ;;  %v2759_v26 = vld [vmem:[%s3707_s3 + $0x154] ss:$8 sps:$4 sm:$0xff]  }
  0xd4   :  { %1501 = vmatprep.subr.bf16.mxu1 %v2660_v27  ;;  %2012 = vmatpush1.bf16.msra.mxu0 %v2739_v43  ;;  %v2757_v27 = vld [vmem:[%s3707_s3 + $0x150] ss:$8 sps:$4 sm:$0xff]   ;;  %v2783_v43 = vld [vmem:[%s3707_s3 + $0x1d4] ss:$8 sps:$4 sm:$0xff]  }
  0xd5   :  { %2022 = vmatprep.subr.bf16.mxu0 %v2744_v47  ;;  %v2789_v47 = vld [vmem:[%s3707_s3 + $0x1f4] ss:$8 sps:$4 sm:$0xff]  }
  0xd7   :  { %1502 = vmatpush1.bf16.msra.mxu1 %v2658_v28  ;;  %v2762_v28 = vld [vmem:[%s3707_s3 + $0x164] ss:$8 sps:$4 sm:$0xff]  }
  0xd8   :  { %1503 = vmatprep.subr.bf16.mxu1 %v2663_v29  ;;  %v2760_v29 = vld [vmem:[%s3707_s3 + $0x160] ss:$8 sps:$4 sm:$0xff]  }
  0xdb   :  { %1504 = vmatpush1.bf16.msra.mxu1 %v2661_v30  ;;  %v2765_v30 = vld [vmem:[%s3707_s3 + $0x174] ss:$8 sps:$4 sm:$0xff]  }
  0xdc   :  { %1505 = vmatprep.subr.bf16.mxu1 %v2666_v31  ;;  %v2763_v31 = vld [vmem:[%s3707_s3 + $0x170] ss:$8 sps:$4 sm:$0xff]  }
  0xdf   :  { %1506 = vmatpush1.bf16.msra.mxu1 %v2664_v32  ;;  %v2768_v32 = vld [vmem:[%s3707_s3 + $0x184] ss:$8 sps:$4 sm:$0xff]  }
  0xe0   :  { %1507 = vmatprep.subr.bf16.mxu1 %v2669_v33  ;;  %v2766_v33 = vld [vmem:[%s3707_s3 + $0x180] ss:$8 sps:$4 sm:$0xff]  }
  0xe3   :  { %1508 = vmatpush1.bf16.msra.mxu1 %v2667_v34  ;;  %v2771_v34 = vld [vmem:[%s3707_s3 + $0x194] ss:$8 sps:$4 sm:$0xff]  }
  0xe4   :  { %1509 = vmatprep.subr.bf16.mxu1 %v2672_v36  ;;  %v2769_v36 = vld [vmem:[%s3707_s3 + $0x190] ss:$8 sps:$4 sm:$0xff]  }
  0xe7   :  { %1510 = vmatpush1.bf16.msra.mxu1 %v2670_v38  ;;  %v2772_v38 = vld [vmem:[%s3707_s3 + $0x1a0] ss:$8 sps:$4 sm:$0xff]  }
  0xe8   :  { %1511 = vmatprep.subr.bf16.mxu1 %v2675_v40  ;;  %v2775_v40 = vld [vmem:[%s3707_s3 + $0x1b0] ss:$8 sps:$4 sm:$0xff]  }
  0xeb   :  { %1512 = vmatpush1.bf16.msra.mxu1 %v2673_v42  ;;  %v2778_v42 = vld [vmem:[%s3707_s3 + $0x1c0] ss:$8 sps:$4 sm:$0xff]  }
  0xec   :  { %1513 = vmatprep.subr.bf16.mxu1 %v2678_v44  ;;  %v2781_v44 = vld [vmem:[%s3707_s3 + $0x1d0] ss:$8 sps:$4 sm:$0xff]  }
  0xef   :  { %1514 = vmatpush1.bf16.msra.mxu1 %v2676_v45  ;;  %v2786_v45 = vld [vmem:[%s3707_s3 + $0x1e4] ss:$8 sps:$4 sm:$0xff]  }
  0xf0   :  { %1515 = vmatprep.subr.bf16.mxu1 %v2681_v46  ;;  %v2784_v46 = vld [vmem:[%s3707_s3 + $0x1e0] ss:$8 sps:$4 sm:$0xff]  }
  0xf3   :  { %1516 = vmatpush1.bf16.msra.mxu1 %v2679_v48  ;;  %v2787_v48 = vld [vmem:[%s3707_s3 + $0x1f0] ss:$8 sps:$4 sm:$0xff]  }
  0xf4   :  { %1517 = vmatprep.subr.bf16.mxu1 %v2684_v49  ;;  %v251_v49 = vsub.s32 2, %v3575_v63 }
  0xf7   :  { %1518 = vmatpush1.bf16.msra.mxu1 %v2682_v50  ;;  %v255_v50 = vsub.s32 3, %v3575_v63 }
  0xf8   :  { %1519 = vmatprep.subr.bf16.mxu1 %v2687_v51 }
  0xfb   :  { %1520 = vmatpush1.bf16.msra.mxu1 %v2685_v53 }
  0xfc   :  { %1521 = vmatprep.subr.bf16.mxu1 %v2690_v54 }
  0xff   :  { %1522 = vmatpush1.bf16.msra.mxu1 %v2688_v55 }
 0x100   :  { %1532 = vmatprep.subr.bf16.mxu1 %v2693_v56 }
 0x102   :  { %1524 = vmatmul.mubr.bf16.vlgmr.msra.gmra.mrb[4].mxu1 %v3259_v16  ;;  %v3583_v16 = vld [vmem:[%s3708_s2] sm:$0xf] }
 0x103   :  { %1533 = vmatpush1.bf16.msra.mxu1 %v2691_v57  ;;  %1564 = vmatprep.mubr.bf16.mxu1 %v2794_v22  ;;  %v3586_v22 = vsub.s32 1, %v3575_v63  ;;  %v252_v51 = vrot.slane %v3583_v16, %v251_v49  ;;  %v256_v53 = vrot.slane %v3583_v16, %v255_v50  ;;  %v12_v63 = vstv %s3709_s6 }
 0x104   :  { %13 = vst [vmem:[#allocation2] sm:$0x1] %v12_v63 }
 0x105   :  { %v248_v1 = vrot.slane %v3583_v16, %v3586_v22 }
 0x10e   :  { %2301 = vmatmul.mubr.msk.bf16.vlgmr.msra.gmra.mrb[4].mxu1 %vm1241_vm0, %v3289_v25  ;;  %v244_v25 = vrot.slane %v3583_v16, %v3578_v0  ;;  %v1649_v16 = vld [vmem:[%s3710_s4] sm:$0x3] }
 0x115   :  { %v1279_v58 = vpop.f32.mrb[0].mxu1 }
 0x116   :  { %v1281_v59 = vpop.f32.mrb[1].mxu1  ;;  %v1280_v2 = vadd.f32 %v1279_v58, %v244_v25 }
 0x117   :  { %v1283_v60 = vpop.f32.mrb[2].mxu1  ;;  %v1282_v3 = vadd.f32 %v1281_v59, %v248_v1 }
 0x118   :  { %v1284_v61 = vpop.f32.mrb[3].mxu1 }
 0x162   :  { %v1402_v4 = vpop.f32.mrb[0].mxu0 }
 0x163   :  { %v2368_v5 = vadd.f32 %v1402_v4, %v1280_v2  ;;  %v1404_v6 = vpop.f32.mrb[1].mxu0  ;;  %v1658_v4 = vrot.slane %v1649_v16, %v3586_v22 }
 0x164   :  { %v2370_v7 = vadd.f32 %v1404_v6, %v1282_v3  ;;  %v1406_v9 = vpop.f32.mrb[2].mxu0  ;;  %v1654_v3 = vrot.slane %v1649_v16, %v3578_v0  ;;  %v2067_v6 = vld [vmem:[%s3711_s5] sm:$0x3] }
 0x165   :  { %v1573_v10 = vmul.f32 0.2, %v2368_v5  ;;  %v1407_v12 = vpop.f32.mrb[3].mxu0 }
 0x166   :  { %v1574_v13 = vmul.f32 0.2, %v2370_v7 }
 0x167   :  { %v1577_v14 = vmax.f32 %v2368_v5, %v1573_v10 }
 0x168   :  { %v1578_v15 = vmax.f32 %v2370_v7, %v1574_v13 }
 0x169   :  { %v1581_v11 = vpack.c.bf16 %v1577_v14, %v1577_v14 }
 0x16a   :  { %v1582_v17 = vpack.c.bf16 %v1578_v15, %v1578_v15  ;;  %v2072_v15 = vrot.slane %v2067_v6, %v3578_v0 }
 0x16c   :  { %2013 = vmatprep.mubr.bf16.mxu0 %v1582_v17 }
 0x16d   :  { %2014 = vmatmul.mubr.bf16.vlgmr.msra.gmra.mrb[4].mxu0 %v1581_v11 }
 0x16e   :  { %2023 = vmatpush1.bf16.msra.mxu0 %v2742_v18  ;;  %v2076_v18 = vrot.slane %v2067_v6, %v3586_v22 }
 0x16f   :  { %2024 = vmatprep.subr.bf16.mxu0 %v2747_v19 }
 0x172   :  { %2025 = vmatpush1.bf16.msra.mxu0 %v2745_v35 }
 0x173   :  { %2026 = vmatprep.subr.bf16.mxu0 %v2750_v20 }
 0x176   :  { %2027 = vmatpush1.bf16.msra.mxu0 %v2748_v21 }
 0x177   :  { %2028 = vmatprep.subr.bf16.mxu0 %v2753_v8  ;;  %v2366_v8 = vld [vmem:[#allocation2] ss:$0 sm:$0xff] }
 0x17a   :  { %2029 = vmatpush1.bf16.msra.mxu0 %v2751_v23 }
 0x17b   :  { %2030 = vmatprep.subr.bf16.mxu0 %v2756_v24 }
 0x17e   :  { %2031 = vmatpush1.bf16.msra.mxu0 %v2754_v52 }
 0x17f   :  { %2032 = vmatprep.subr.bf16.mxu0 %v2759_v26 }
 0x182   :  { %2033 = vmatpush1.bf16.msra.mxu0 %v2757_v27 }
 0x183   :  { %2034 = vmatprep.subr.bf16.mxu0 %v2762_v28 }
 0x186   :  { %2035 = vmatpush1.bf16.msra.mxu0 %v2760_v29 }
 0x187   :  { %2036 = vmatprep.subr.bf16.mxu0 %v2765_v30 }
 0x18a   :  { %2037 = vmatpush1.bf16.msra.mxu0 %v2763_v31 }
 0x18b   :  { %2038 = vmatprep.subr.bf16.mxu0 %v2768_v32 }
 0x18e   :  { %2039 = vmatpush1.bf16.msra.mxu0 %v2766_v33 }
 0x18f   :  { %2040 = vmatprep.subr.bf16.mxu0 %v2771_v34 }
 0x192   :  { %2041 = vmatpush1.bf16.msra.mxu0 %v2769_v36 }
 0x193   :  { %2042 = vmatprep.subr.bf16.mxu0 %v2774_v37 }
 0x196   :  { %2043 = vmatpush1.bf16.msra.mxu0 %v2772_v38 }
 0x197   :  { %2044 = vmatprep.subr.bf16.mxu0 %v2777_v39 }
 0x19a   :  { %2045 = vmatpush1.bf16.msra.mxu0 %v2775_v40 }
 0x19b   :  { %2046 = vmatprep.subr.bf16.mxu0 %v2780_v41 }
 0x19e   :  { %2047 = vmatpush1.bf16.msra.mxu0 %v2778_v42 }
 0x19f   :  { %2048 = vmatprep.subr.bf16.mxu0 %v2783_v43 }
 0x1a2   :  { %2049 = vmatpush1.bf16.msra.mxu0 %v2781_v44 }
 0x1a3   :  { %2050 = vmatprep.subr.bf16.mxu0 %v2786_v45 }
 0x1a6   :  { %2051 = vmatpush1.bf16.msra.mxu0 %v2784_v46 }
 0x1a7   :  { %2052 = vmatprep.subr.bf16.mxu0 %v2789_v47 }
 0x1aa   :  { %2053 = vmatpush1.bf16.msra.mxu0 %v2787_v48 }
 0x1e1   :  { %v1566_v54 = vpop.f32.mrb[4].mxu1 }
 0x1e2   :  { %v2371_v55 = vadd.f32 %v1566_v54, %v252_v51  ;;  %v1568_v56 = vpop.f32.mrb[5].mxu1 }
 0x1e3   :  { %v2372_v57 = vadd.f32 %v1568_v56, %v256_v53  ;;  %v1570_v58 = vpop.f32.mrb[6].mxu1 }
 0x1e4   :  { %v1575_v59 = vmul.f32 0.2, %v2371_v55  ;;  %v1571_v60 = vpop.f32.mrb[7].mxu1 }
 0x1e5   :  { %v1576_v61 = vmul.f32 0.2, %v2372_v57 }
 0x1e6   :  { %v1579_v62 = vmax.f32 %v2371_v55, %v1575_v59 }
 0x1e7   :  { %v1580_v25 = vmax.f32 %v2372_v57, %v1576_v61 }
 0x1e8   :  { %v1583_v2 = vpack.c.bf16 %v1579_v62, %v1579_v62 }
 0x1e9   :  { %v1584_v1 = vpack.c.bf16 %v1580_v25, %v1580_v25 }
 0x1eb   :  { %2054 = vmatprep.mubr.bf16.mxu0 %v1584_v1 }
 0x1ec   :  { %2055 = vmatmul.mubr.bf16.vlgmr.msra.gmra.mrb[4].mxu0 %v1583_v2 }
 0x2bf   :  { %v2056_v5 = vpop.f32.mrb[4].mxu0 }
 0x2c0   :  { %v2373_v7 = vadd.f32 %v2056_v5, %v1654_v3  ;;  %v2058_v9 = vpop.f32.mrb[5].mxu0 }
 0x2c1   :  { %v2374_v10 = vadd.f32 %v2058_v9, %v1658_v4  ;;  %v2060_v12 = vpop.f32.mrb[6].mxu0 }
 0x2c2   :  { %v2063_v13 = vmul.f32 0.2, %v2373_v7  ;;  %v2061_v14 = vpop.f32.mrb[7].mxu0 }
 0x2c3   :  { %v2064_v17 = vmul.f32 0.2, %v2374_v10 }
 0x2c4   :  { %v2065_v11 = vmax.f32 %v2373_v7, %v2063_v13 }
 0x2c5   :  { %v2066_v19 = vmax.f32 %v2374_v10, %v2064_v17 }
 0x2c6   :  { %v2079_v35 = vmul.f32 %v2072_v15, %v2065_v11 }
 0x2c7   :  { %v2080_v20 = vmul.f32 %v2076_v18, %v2066_v19 }
 0x2c9   :  { %v2081_v21 = vadd.f32 %v2080_v20, %v2079_v35 }
 0x2cb   :  { %2082 = vadd.xlane.f32.xlu0 %v2081_v21 }
 0x358   :  { %v2083_v23 = vpop.xlane.xlu0 %2082 }
 0x359   :  { %v2091_v24 = vadd.f32 %v2366_v8, %v2083_v23 }
 0x35b   :  { %v2092_v52 = vsub.f32 0.0, %v2091_v24 }
 0x35d   :  { %v2093_v26 = vmul.f32 1.442695, %v2092_v52 }
 0x35f   :  { %2790 = vpow2.f32 %v2093_v26 }
 0x369   :  { %v2791_v27 = vpop.eup %2790 }
 0x36a   :  { %v2095_v28 = vadd.f32 1.0, %v2791_v27 }
 0x36c   :  { %2792 = vrcp.f32 %v2095_v28 }
 0x376   :  { %v2793_v0 = vpop.eup %2792 }
 0x377   :  { %2099 = vst.msk [vmem:[%s3712_s7] sm:$0xff] %vm2098_vm1, %v2793_v0 }

</bundles_post_ra>
